<compile_context>
chip_gen: v6e
topology: v6e:2x2x1
jax: 0.10.0
libtpu: 0.0.40
codegen_flags: <defaults>
</compile_context>

<pallas_src>
import functools

import jax
import jax.numpy as jnp
from jax.experimental import pallas as pl
from jax.experimental.pallas import tpu as pltpu


def _layer_norm(x, gamma, beta, eps=1e-5):
    # PyTorch nn.LayerNorm semantics: biased variance over the last dim.
    mu = jnp.mean(x, axis=-1, keepdims=True)
    xc = x - mu
    var = jnp.mean(xc * xc, axis=-1, keepdims=True)
    return xc * jax.lax.rsqrt(var + eps) * gamma + beta


def _graph_encoder_kernel(
    # inputs (VMEM)
    h_ref,                       # [N, D]   input features (read once, l == 0)
    mb_ref,                      # [N, N]   pre-fused mask + bias (f32)
    wc_ref,                      # [D, D]   all heads' projection, concatenated on lanes
    wa_ref,                      # [D, 2H]  [W@a1 | W@a2]
    w1_ref, w2_ref,              # [D, Hid], [Hid, D]
    vecs_ref,                    # [6, P]   an_g, an_b, fn_g, fn_b, b1, b2 (f32)
    nrm_ref,                     # [2, D]   final LN gamma / beta (f32)
    # output — also the layer-carried accumulator (resident across layer axis)
    out_ref,                     # [N, D] f32
    *, heads, dh, hid, alpha, mxu_dtype,
):
    l = pl.program_id(1)
    last = pl.num_programs(1) - 1
    d = out_ref.shape[-1]

    @pl.when(l == 0)
    def _init():
        out_ref[...] = h_ref[...].astype(jnp.float32)

    h = out_ref[...]                      # [N, D] f32 carried state
    masked_bias = mb_ref[...]             # [N, N] f32

    an_g = vecs_ref[0:1, :d]
    an_b = vecs_ref[1:2, :d]
    fn_g = vecs_ref[2:3, :d]
    fn_b = vecs_ref[3:4, :d]
    b1 = vecs_ref[4:5, :hid]
    b2 = vecs_ref[5:6, :d]

    # ---- pre-LN multi-head graph (GAT-style) self-attention + residual ----
    y = _layer_norm(h, an_g, an_b)
    y_m = y.astype(mxu_dtype)
    # one fused projection for all heads: wh[:, hd*dh:(hd+1)*dh] == y @ W[l,hd]
    wh = jnp.dot(y_m, wc_ref[...], preferred_element_type=jnp.float32)    # [N, D]
    # f12[:, hd]    == sum_k (y @ W[l,hd]) * a1[l,hd]
    # f12[:, H+hd]  == sum_k (y @ W[l,hd]) * a2[l,hd]
    f12 = jnp.dot(y_m, wa_ref[...], preferred_element_type=jnp.float32)   # [N, 2H]
    f1 = f12[:, :heads]
    f2t = jnp.transpose(f12[:, heads:])                                   # [H, N]

    # TODO(synk): for N >> 256 tile the query rows here (inner fori_loop) so the
    # [N,N] score/exp working set does not spill vregs / blow the v7x VMEM budget.
    head_outs = []
    for hd in range(heads):
        e = f1[:, hd:hd + 1] + f2t[hd:hd + 1, :]                          # [N, N]
        e = jnp.where(e > 0, e, alpha * e)                                # LeakyReLU(alpha)
        e = e + masked_bias
        e = e - jnp.max(e, axis=-1, keepdims=True)
        p = jnp.exp(e)
        s = jnp.sum(p, axis=-1, keepdims=True)                            # [N, 1]
        av = jnp.dot(p.astype(mxu_dtype),
                     wh[:, hd * dh:(hd + 1) * dh].astype(mxu_dtype),
                     preferred_element_type=jnp.float32)                  # [N, Dh]
        # deferred softmax normalization (EUP reciprocal, off the VALU slot)
        head_outs.append(av * pl.reciprocal(s, approx=True))
    h = h + jnp.concatenate(head_outs, axis=-1)                           # single [N,D] residual

    # ---- pre-LN feed-forward + residual ----
    y = _layer_norm(h, fn_g, fn_b)
    z = jnp.dot(y.astype(mxu_dtype), w1_ref[...],
                preferred_element_type=jnp.float32) + b1
    z = jnp.maximum(z, 0.0)
    h = h + jnp.dot(z.astype(mxu_dtype), w2_ref[...],
                    preferred_element_type=jnp.float32) + b2

    @pl.when(l != last)
    def _store():
        out_ref[...] = h

    @pl.when(l == last)
    def _final():
        out_ref[...] = _layer_norm(h, nrm_ref[0:1, :], nrm_ref[1:2, :])


def init_graph_encoder_params(key, layers, inputs, heads, hidden):
    assert inputs % heads == 0
    dh = inputs // heads
    k = jax.random.split(key, 5)
    scale = 0.1
    return dict(
        an_g=jnp.ones((layers, 1, inputs), jnp.float32),
        an_b=jnp.zeros((layers, 1, inputs), jnp.float32),
        W=scale * jax.random.normal(k[0], (layers, heads, inputs, dh), jnp.float32),
        a1=scale * jax.random.normal(k[1], (layers, heads, 1, dh), jnp.float32),
        a2=scale * jax.random.normal(k[2], (layers, heads, 1, dh), jnp.float32),
        fn_g=jnp.ones((layers, 1, inputs), jnp.float32),
        fn_b=jnp.zeros((layers, 1, inputs), jnp.float32),
        W1=scale * jax.random.normal(k[3], (layers, inputs, hidden), jnp.float32),
        b1=jnp.zeros((layers, 1, hidden), jnp.float32),
        W2=scale * jax.random.normal(k[4], (layers, hidden, inputs), jnp.float32),
        b2=jnp.zeros((layers, 1, inputs), jnp.float32),
        ng=jnp.ones((1, inputs), jnp.float32),
        nb=jnp.zeros((1, inputs), jnp.float32),
    )


def graph_encoder_forward(h, num_agent, adj, bias, params, *, heads,
                          alpha=0.1, weight_dtype=jnp.float32):
    """h: [N,D] or [B,N,D]; adj/bias: [N,N] or [B,N,N]; num_agent: int / scalar / [B]."""
    squeeze = h.ndim == 2
    if squeeze:
        h = h[None]
    B, n, d = h.shape
    assert d % heads == 0
    dh = d // heads
    layers = params["W"].shape[0]
    hidden = params["W1"].shape[-1]

    if adj.ndim == 2:
        adj = jnp.broadcast_to(adj, (B, n, n))
    if bias is None:
        bias = jnp.zeros((B, n, n), jnp.float32)
    elif bias.ndim == 2:
        bias = jnp.broadcast_to(bias, (B, n, n))

    # --- host-side fusion of adjacency + num_agent mask + bias (traced scalar
    #     num_agent -> no recompile when it changes at runtime) ---
    na = jnp.asarray(num_agent, jnp.int32).reshape(-1, 1, 1)
    col = jnp.arange(n, dtype=jnp.int32)[None, None, :]
    valid = jnp.logical_and(adj > 0, col < na)
    masked_bias = jnp.where(valid, bias.astype(jnp.float32), jnp.float32(-1e30))

    # --- algebraic fusion of per-head GAT parameters (tiny, done once) ---
    W = params["W"]                                                  # [L,H,D,Dh]
    w_cat = jnp.transpose(W, (0, 2, 1, 3)).reshape(layers, d, d).astype(weight_dtype)
    wa1 = jnp.einsum("lhdk,lhk->ldh", W, params["a1"][:, :, 0, :])
    wa2 = jnp.einsum("lhdk,lhk->ldh", W, params["a2"][:, :, 0, :])
    wa12 = jnp.concatenate([wa1, wa2], axis=-1).astype(weight_dtype)  # [L,D,2H]
    w1 = params["W1"].astype(weight_dtype)
    w2 = params["W2"].astype(weight_dtype)

    # --- pack the six per-layer row vectors into one operand (fewer DMAs) ---
    P = max(d, hidden)

    def pad_p(x):
        return jnp.pad(x.astype(jnp.float32),
                       ((0, 0), (0, 0), (0, P - x.shape[-1])))

    vecs = jnp.concatenate([pad_p(params["an_g"]), pad_p(params["an_b"]),
                            pad_p(params["fn_g"]), pad_p(params["fn_b"]),
                            pad_p(params["b1"]), pad_p(params["b2"])],
                           axis=1)                                    # [L,6,P]
    nrm = jnp.concatenate([params["ng"], params["nb"]],
                          axis=0).astype(jnp.float32)                 # [2,D]

    kernel = functools.partial(
        _graph_encoder_kernel, heads=heads, dh=dh, hid=hidden,
        alpha=float(alpha), mxu_dtype=weight_dtype)

    per_b = lambda b, l: (b, 0, 0)      # resident across the layer axis
    per_l = lambda b, l: (l, 0, 0)      # one layer's weights per step
    fixed = lambda b, l: (0, 0)

    wbytes = jnp.dtype(weight_dtype).itemsize
    flops = B * layers * (2 * n * d * d + 4 * n * d * heads
                          + 2 * n * n * d + 4 * n * d * hidden)
    transcendentals = B * layers * (heads * n * n + heads * n + 4 * n)
    bytes_accessed = (B * (2 * n * d + n * n) * 4
                      + B * layers * (d * d + 2 * d * heads + 2 * d * hidden) * wbytes
                      + B * layers * 6 * P * 4)

    grid_spec = pltpu.PrefetchScalarGridSpec(
        num_scalar_prefetch=0,
        grid=(B, layers),
        in_specs=[
            pl.BlockSpec((None, n, d), per_b),           # h
            pl.BlockSpec((None, n, n), per_b),           # fused mask + bias
            pl.BlockSpec((None, d, d), per_l),           # all-head projection W
            pl.BlockSpec((None, d, 2 * heads), per_l),   # [W@a1 | W@a2]
            pl.BlockSpec((None, d, hidden), per_l),      # W1
            pl.BlockSpec((None, hidden, d), per_l),      # W2
            pl.BlockSpec((None, 6, P), per_l),           # packed per-layer vectors
            pl.BlockSpec((2, d), fixed),                 # final LN gamma/beta
        ],
        out_specs=pl.BlockSpec((None, n, d), per_b),     # resident accumulator
    )

    # TODO(synk): for production shapes (large N/D/Hid) set
    # pltpu.CompilerParams(vmem_limit_bytes=...) from the streamed-weight +
    # resident-block footprint (v5e scoped default is only 16 MiB).
    out = pl.pallas_call(
        kernel,
        out_shape=jax.ShapeDtypeStruct((B, n, d), jnp.float32),
        grid_spec=grid_spec,
        compiler_params=pltpu.CompilerParams(
            dimension_semantics=("parallel", "arbitrary")),
        cost_estimate=pl.CostEstimate(flops=flops,
                                      transcendentals=transcendentals,
                                      bytes_accessed=bytes_accessed),
    )(h, masked_bias, w_cat, wa12, w1, w2, vecs, nrm)

    return out[0] if squeeze else out


def _reference(h, num_agent, adj, bias, params, heads, alpha):
    """Pure-JAX reference with the original (unfused, per-head) formulation."""
    layers = params["W"].shape[0]
    n, d = h.shape
    col = jnp.arange(n)[None, :]
    valid = jnp.logical_and(adj > 0, col < num_agent)

    def ln(x, g, b, eps=1e-5):
        mu = x.mean(-1, keepdims=True)
        xc = x - mu
        return xc / jnp.sqrt((xc * xc).mean(-1, keepdims=True) + eps) * g + b

    for l in range(layers):
        y = ln(h, params["an_g"][l], params["an_b"][l])
        outs = []
        for hd in range(heads):
            wh = y @ params["W"][l, hd]
            f1 = (wh * params["a1"][l, hd]).sum(-1, keepdims=True)
            f2 = (wh * params["a2"][l, hd]).sum(-1, keepdims=True)
            e = f1 + f2.T
            e = jnp.where(e > 0, e, alpha * e)
            e = e + bias
            e = jnp.where(valid, e, -1e30)
            a = jax.nn.softmax(e, axis=-1)
            outs.append(a @ wh)
        h = h + jnp.concatenate(outs, axis=-1)
        y = ln(h, params["fn_g"][l], params["fn_b"][l])
        z = jnp.maximum(y @ params["W1"][l] + params["b1"][l], 0.0)
        h = h + z @ params["W2"][l] + params["b2"][l]
    return ln(h, params["ng"], params["nb"])


if __name__ == "__main__":
    # Small deterministic example consistent with the module:
    # B graphs x N agents x `inputs` features; heads divide inputs.
    LAYERS, INPUTS, HEADS, HIDDEN = 2, 32, 4, 64
    B, N, NUM_AGENT = 2, 8, 6

    key = jax.random.PRNGKey(0)
    k_h, k_p = jax.random.split(key)

    h = jax.random.normal(k_h, (B, N, INPUTS), jnp.float32)
    adj = jnp.ones((N, N), jnp.float32)          # fully connected graph
    bias = None                                  # optional attention bias
    params = init_graph_encoder_params(k_p, LAYERS, INPUTS, HEADS, HIDDEN)

    # f32 weight path (exact-ish; approx reciprocal is the only relaxation)
    out = graph_encoder_forward(h, NUM_AGENT, adj, bias, params,
                                heads=HEADS, alpha=0.1,
                                weight_dtype=jnp.float32)
    out = jax.block_until_ready(out)

    zero_bias = jnp.zeros((N, N), jnp.float32)
    ref = jnp.stack([
        _reference(h[b], NUM_AGENT, adj, zero_bias, params, HEADS, 0.1)
        for b in range(B)])
    ref = jax.block_until_ready(ref)

    assert out.shape == (B, N, INPUTS) and bool(jnp.all(jnp.isfinite(out)))
    err = float(jnp.max(jnp.abs(out - ref)))
    assert err < 5e-3, f"f32 path mismatch: {err}"

    # bf16 streamed-weight fast path (v6e/v7x): halved weight DMA + full-rate MXU.
    out_bf16 = jax.block_until_ready(
        graph_encoder_forward(h, NUM_AGENT, adj, bias, params,
                              heads=HEADS, alpha=0.1,
                              weight_dtype=jnp.bfloat16))
    err_bf16 = float(jnp.max(jnp.abs(out_bf16 - ref)))
    assert bool(jnp.all(jnp.isfinite(out_bf16))) and err_bf16 < 6e-2, \
        f"bf16 path mismatch: {err_bf16}"

    print("KERNEL_OK")
</pallas_src>

<mosaic_0001>
module attributes {stable_mosaic.version = 11 : i64} {
  func.func @_graph_encoder_kernel(%arg0: i32, %arg1: i32, %arg2: memref<1x8x32xf32, #tpu.memory_space<vmem>>, %arg3: memref<1x8x8xf32, #tpu.memory_space<vmem>>, %arg4: memref<1x32x32xf32, #tpu.memory_space<vmem>>, %arg5: memref<1x32x8xf32, #tpu.memory_space<vmem>>, %arg6: memref<1x32x64xf32, #tpu.memory_space<vmem>>, %arg7: memref<1x64x32xf32, #tpu.memory_space<vmem>>, %arg8: memref<1x6x64xf32, #tpu.memory_space<vmem>>, %arg9: memref<2x32xf32, #tpu.memory_space<vmem>>, %arg10: memref<1x8x32xf32, #tpu.memory_space<vmem>>) attributes {dimension_semantics = [#tpu.dimension_semantics<parallel>, #tpu.dimension_semantics<arbitrary>], iteration_bounds = array<i64: 2, 2>, scalar_prefetch = 0 : i64, scratch_operands = 0 : i64, tpu.core_type = #tpu.core_type<tc>, window_params = [{transform_indices = @transform_0, window_bounds = array<i64: 1, 8, 32>}, {transform_indices = @transform_1, window_bounds = array<i64: 1, 8, 8>}, {transform_indices = @transform_2, window_bounds = array<i64: 1, 32, 32>}, {transform_indices = @transform_3, window_bounds = array<i64: 1, 32, 8>}, {transform_indices = @transform_4, window_bounds = array<i64: 1, 32, 64>}, {transform_indices = @transform_5, window_bounds = array<i64: 1, 64, 32>}, {transform_indices = @transform_6, window_bounds = array<i64: 1, 6, 64>}, {pipeline_mode = #tpu.pipeline_mode<synchronous>, transform_indices = @transform_7, window_bounds = array<i64: 2, 32>}, {transform_indices = @transform_8, window_bounds = array<i64: 1, 8, 32>}]} {
    %c0_i32 = arith.constant 0 : i32
    %0 = arith.cmpi eq, %arg1, %c0_i32 : i32
    %1 = arith.extui %0 : i1 to i32
    %c0_i32_0 = arith.constant 0 : i32
    %2 = arith.cmpi ne, %1, %c0_i32_0 : i32
    scf.if %2 {
      %c0_68 = arith.constant 0 : index
      %c0_69 = arith.constant 0 : index
      %c0_70 = arith.constant 0 : index
      %181 = vector.load %arg2[%c0_68, %c0_69, %c0_70] : memref<1x8x32xf32, #tpu.memory_space<vmem>>, vector<1x8x32xf32>
      %182 = vector.shape_cast %181 : vector<1x8x32xf32> to vector<8x32xf32>
      %c0_71 = arith.constant 0 : index
      %c0_72 = arith.constant 0 : index
      %c0_73 = arith.constant 0 : index
      %183 = vector.load %arg10[%c0_71, %c0_72, %c0_73] : memref<1x8x32xf32, #tpu.memory_space<vmem>>, vector<1x8x32xf32>
      %184 = vector.shape_cast %183 : vector<1x8x32xf32> to vector<8x32xf32>
      %185 = vector.shape_cast %182 : vector<8x32xf32> to vector<1x8x32xf32>
      tpu.vector_store %arg10[%c0_71, %c0_72, %c0_73], %185 {strides = array<i32>} : memref<1x8x32xf32, #tpu.memory_space<vmem>>, vector<1x8x32xf32>,
    } else {
    }
    %c0 = arith.constant 0 : index
    %c0_1 = arith.constant 0 : index
    %c0_2 = arith.constant 0 : index
    %3 = vector.load %arg10[%c0, %c0_1, %c0_2] : memref<1x8x32xf32, #tpu.memory_space<vmem>>, vector<1x8x32xf32>
    %4 = vector.shape_cast %3 : vector<1x8x32xf32> to vector<8x32xf32>
    %c0_3 = arith.constant 0 : index
    %c0_4 = arith.constant 0 : index
    %c0_5 = arith.constant 0 : index
    %5 = vector.load %arg3[%c0_3, %c0_4, %c0_5] : memref<1x8x8xf32, #tpu.memory_space<vmem>>, vector<1x8x8xf32>
    %6 = vector.shape_cast %5 : vector<1x8x8xf32> to vector<8x8xf32>
    %c0_6 = arith.constant 0 : index
    %c0_7 = arith.constant 0 : index
    %c0_8 = arith.constant 0 : index
    %7 = vector.load %arg8[%c0_6, %c0_7, %c0_8] : memref<1x6x64xf32, #tpu.memory_space<vmem>>, vector<1x1x32xf32>
    %8 = vector.shape_cast %7 : vector<1x1x32xf32> to vector<1x32xf32>
    %c0_9 = arith.constant 0 : index
    %c1 = arith.constant 1 : index
    %c0_10 = arith.constant 0 : index
    %9 = vector.load %arg8[%c0_9, %c1, %c0_10] : memref<1x6x64xf32, #tpu.memory_space<vmem>>, vector<1x1x32xf32>
    %10 = vector.shape_cast %9 : vector<1x1x32xf32> to vector<1x32xf32>
    %c0_11 = arith.constant 0 : index
    %c2 = arith.constant 2 : index
    %c0_12 = arith.constant 0 : index
    %11 = vector.load %arg8[%c0_11, %c2, %c0_12] : memref<1x6x64xf32, #tpu.memory_space<vmem>>, vector<1x1x32xf32>
    %12 = vector.shape_cast %11 : vector<1x1x32xf32> to vector<1x32xf32>
    %c0_13 = arith.constant 0 : index
    %c3 = arith.constant 3 : index
    %c0_14 = arith.constant 0 : index
    %13 = vector.load %arg8[%c0_13, %c3, %c0_14] : memref<1x6x64xf32, #tpu.memory_space<vmem>>, vector<1x1x32xf32>
    %14 = vector.shape_cast %13 : vector<1x1x32xf32> to vector<1x32xf32>
    %c0_15 = arith.constant 0 : index
    %c4 = arith.constant 4 : index
    %c0_16 = arith.constant 0 : index
    %15 = vector.load %arg8[%c0_15, %c4, %c0_16] : memref<1x6x64xf32, #tpu.memory_space<vmem>>, vector<1x1x64xf32>
    %16 = vector.shape_cast %15 : vector<1x1x64xf32> to vector<1x64xf32>
    %c0_17 = arith.constant 0 : index
    %c5 = arith.constant 5 : index
    %c0_18 = arith.constant 0 : index
    %17 = vector.load %arg8[%c0_17, %c5, %c0_18] : memref<1x6x64xf32, #tpu.memory_space<vmem>>, vector<1x1x32xf32>
    %18 = vector.shape_cast %17 : vector<1x1x32xf32> to vector<1x32xf32>
    %cst = arith.constant dense<0.000000e+00> : vector<8xf32>
    %19 = vector.multi_reduction <add>, %4, %cst [1] : vector<8x32xf32> to vector<8xf32>
    %20 = vector.shape_cast %19 : vector<8xf32> to vector<8x1xf32>
    %cst_19 = arith.constant 3.200000e+01 : f32
    %21 = vector.broadcast %cst_19 : f32 to vector<8x1xf32>
    %22 = arith.divf %20, %21 : vector<8x1xf32>
    %23 = vector.broadcast %22 : vector<8x1xf32> to vector<8x32xf32>
    %24 = arith.subf %4, %23 : vector<8x32xf32>
    %25 = arith.mulf %24, %24 : vector<8x32xf32>
    %cst_20 = arith.constant dense<0.000000e+00> : vector<8xf32>
    %26 = vector.multi_reduction <add>, %25, %cst_20 [1] : vector<8x32xf32> to vector<8xf32>
    %27 = vector.shape_cast %26 : vector<8xf32> to vector<8x1xf32>
    %cst_21 = arith.constant 3.200000e+01 : f32
    %28 = vector.broadcast %cst_21 : f32 to vector<8x1xf32>
    %29 = arith.divf %27, %28 : vector<8x1xf32>
    %cst_22 = arith.constant 9.99999974E-6 : f32
    %30 = vector.broadcast %cst_22 : f32 to vector<8x1xf32>
    %31 = arith.addf %29, %30 : vector<8x1xf32>
    %32 = math.rsqrt %31 : vector<8x1xf32>
    %33 = vector.broadcast %32 : vector<8x1xf32> to vector<8x32xf32>
    %34 = arith.mulf %24, %33 : vector<8x32xf32>
    %35 = vector.broadcast %8 : vector<1x32xf32> to vector<8x32xf32>
    %36 = arith.mulf %34, %35 : vector<8x32xf32>
    %37 = vector.broadcast %10 : vector<1x32xf32> to vector<8x32xf32>
    %38 = arith.addf %36, %37 : vector<8x32xf32>
    %c0_23 = arith.constant 0 : index
    %c0_24 = arith.constant 0 : index
    %c0_25 = arith.constant 0 : index
    %39 = vector.load %arg4[%c0_23, %c0_24, %c0_25] : memref<1x32x32xf32, #tpu.memory_space<vmem>>, vector<1x32x32xf32>
    %40 = vector.shape_cast %39 : vector<1x32x32xf32> to vector<32x32xf32>
    %cst_26 = arith.constant dense<0.000000e+00> : vector<8x32xf32>
    %41 = tpu.matmul %38, %40, %cst_26 {dimension_numbers = #tpu.dot_dimension_numbers<[1], [0], [0], [1], [0, 0, 1, 1], [], []>} : vector<8x32xf32>, vector<32x32xf32>, vector<8x32xf32> -> vector<8x32xf32>
    %c0_27 = arith.constant 0 : index
    %c0_28 = arith.constant 0 : index
    %c0_29 = arith.constant 0 : index
    %42 = vector.load %arg5[%c0_27, %c0_28, %c0_29] : memref<1x32x8xf32, #tpu.memory_space<vmem>>, vector<1x32x8xf32>
    %43 = vector.shape_cast %42 : vector<1x32x8xf32> to vector<32x8xf32>
    %cst_30 = arith.constant dense<0.000000e+00> : vector<8x8xf32>
    %44 = tpu.matmul %38, %43, %cst_30 {dimension_numbers = #tpu.dot_dimension_numbers<[1], [0], [0], [1], [0, 0, 1, 1], [], []>} : vector<8x32xf32>, vector<32x8xf32>, vector<8x8xf32> -> vector<8x8xf32>
    %45 = vector.extract_strided_slice %44 {offsets = [0, 0], sizes = [8, 4], strides = [1, 1]} : vector<8x8xf32> to vector<8x4xf32>
    %46 = vector.extract_strided_slice %44 {offsets = [0, 4], sizes = [8, 4], strides = [1, 1]} : vector<8x8xf32> to vector<8x4xf32>
    %47 = tpu.transpose %46, [1, 0] : vector<8x4xf32> -> vector<4x8xf32>
    %48 = vector.extract_strided_slice %45 {offsets = [0, 0], sizes = [8, 1], strides = [1, 1]} : vector<8x4xf32> to vector<8x1xf32>
    %49 = vector.extract_strided_slice %47 {offsets = [0, 0], sizes = [1, 8], strides = [1, 1]} : vector<4x8xf32> to vector<1x8xf32>
    %50 = vector.broadcast %48 : vector<8x1xf32> to vector<8x8xf32>
    %51 = vector.broadcast %49 : vector<1x8xf32> to vector<8x8xf32>
    %52 = arith.addf %50, %51 : vector<8x8xf32>
    %cst_31 = arith.constant 0.000000e+00 : f32
    %53 = vector.broadcast %cst_31 : f32 to vector<8x8xf32>
    %54 = arith.cmpf ogt, %52, %53 : vector<8x8xf32>
    %cst_32 = arith.constant 1.000000e-01 : f32
    %55 = vector.broadcast %cst_32 : f32 to vector<8x8xf32>
    %56 = arith.mulf %55, %52 : vector<8x8xf32>
    %57 = arith.select %54, %52, %56 : vector<8x8xi1>, vector<8x8xf32>
    %58 = arith.addf %57, %6 : vector<8x8xf32>
    %cst_33 = arith.constant dense<0xFF800000> : vector<8xf32>
    %59 = vector.multi_reduction <maximumf>, %58, %cst_33 [1] : vector<8x8xf32> to vector<8xf32>
    %60 = vector.shape_cast %59 : vector<8xf32> to vector<8x1xf32>
    %61 = vector.broadcast %60 : vector<8x1xf32> to vector<8x8xf32>
    %62 = arith.subf %58, %61 : vector<8x8xf32>
    %63 = math.exp %62 : vector<8x8xf32>
    %cst_34 = arith.constant dense<0.000000e+00> : vector<8xf32>
    %64 = vector.multi_reduction <add>, %63, %cst_34 [1] : vector<8x8xf32> to vector<8xf32>
    %65 = vector.shape_cast %64 : vector<8xf32> to vector<8x1xf32>
    %66 = vector.extract_strided_slice %41 {offsets = [0, 0], sizes = [8, 8], strides = [1, 1]} : vector<8x32xf32> to vector<8x8xf32>
    %cst_35 = arith.constant dense<0.000000e+00> : vector<8x8xf32>
    %67 = tpu.matmul %63, %66, %cst_35 {dimension_numbers = #tpu.dot_dimension_numbers<[1], [0], [0], [1], [0, 0, 1, 1], [], []>} : vector<8x8xf32>, vector<8x8xf32>, vector<8x8xf32> -> vector<8x8xf32>
    %68 = tpu.reciprocal %65 {approx = true} : vector<8x1xf32> -> vector<8x1xf32>
    %69 = vector.broadcast %68 : vector<8x1xf32> to vector<8x8xf32>
    %70 = arith.mulf %67, %69 : vector<8x8xf32>
    %71 = vector.extract_strided_slice %45 {offsets = [0, 1], sizes = [8, 1], strides = [1, 1]} : vector<8x4xf32> to vector<8x1xf32>
    %72 = vector.extract_strided_slice %47 {offsets = [1, 0], sizes = [1, 8], strides = [1, 1]} : vector<4x8xf32> to vector<1x8xf32>
    %73 = vector.broadcast %71 : vector<8x1xf32> to vector<8x8xf32>
    %74 = vector.broadcast %72 : vector<1x8xf32> to vector<8x8xf32>
    %75 = arith.addf %73, %74 : vector<8x8xf32>
    %cst_36 = arith.constant 0.000000e+00 : f32
    %76 = vector.broadcast %cst_36 : f32 to vector<8x8xf32>
    %77 = arith.cmpf ogt, %75, %76 : vector<8x8xf32>
    %cst_37 = arith.constant 1.000000e-01 : f32
    %78 = vector.broadcast %cst_37 : f32 to vector<8x8xf32>
    %79 = arith.mulf %78, %75 : vector<8x8xf32>
    %80 = arith.select %77, %75, %79 : vector<8x8xi1>, vector<8x8xf32>
    %81 = arith.addf %80, %6 : vector<8x8xf32>
    %cst_38 = arith.constant dense<0xFF800000> : vector<8xf32>
    %82 = vector.multi_reduction <maximumf>, %81, %cst_38 [1] : vector<8x8xf32> to vector<8xf32>
    %83 = vector.shape_cast %82 : vector<8xf32> to vector<8x1xf32>
    %84 = vector.broadcast %83 : vector<8x1xf32> to vector<8x8xf32>
    %85 = arith.subf %81, %84 : vector<8x8xf32>
    %86 = math.exp %85 : vector<8x8xf32>
    %cst_39 = arith.constant dense<0.000000e+00> : vector<8xf32>
    %87 = vector.multi_reduction <add>, %86, %cst_39 [1] : vector<8x8xf32> to vector<8xf32>
    %88 = vector.shape_cast %87 : vector<8xf32> to vector<8x1xf32>
    %89 = vector.extract_strided_slice %41 {offsets = [0, 8], sizes = [8, 8], strides = [1, 1]} : vector<8x32xf32> to vector<8x8xf32>
    %cst_40 = arith.constant dense<0.000000e+00> : vector<8x8xf32>
    %90 = tpu.matmul %86, %89, %cst_40 {dimension_numbers = #tpu.dot_dimension_numbers<[1], [0], [0], [1], [0, 0, 1, 1], [], []>} : vector<8x8xf32>, vector<8x8xf32>, vector<8x8xf32> -> vector<8x8xf32>
    %91 = tpu.reciprocal %88 {approx = true} : vector<8x1xf32> -> vector<8x1xf32>
    %92 = vector.broadcast %91 : vector<8x1xf32> to vector<8x8xf32>
    %93 = arith.mulf %90, %92 : vector<8x8xf32>
    %94 = vector.extract_strided_slice %45 {offsets = [0, 2], sizes = [8, 1], strides = [1, 1]} : vector<8x4xf32> to vector<8x1xf32>
    %95 = vector.extract_strided_slice %47 {offsets = [2, 0], sizes = [1, 8], strides = [1, 1]} : vector<4x8xf32> to vector<1x8xf32>
    %96 = vector.broadcast %94 : vector<8x1xf32> to vector<8x8xf32>
    %97 = vector.broadcast %95 : vector<1x8xf32> to vector<8x8xf32>
    %98 = arith.addf %96, %97 : vector<8x8xf32>
    %cst_41 = arith.constant 0.000000e+00 : f32
    %99 = vector.broadcast %cst_41 : f32 to vector<8x8xf32>
    %100 = arith.cmpf ogt, %98, %99 : vector<8x8xf32>
    %cst_42 = arith.constant 1.000000e-01 : f32
    %101 = vector.broadcast %cst_42 : f32 to vector<8x8xf32>
    %102 = arith.mulf %101, %98 : vector<8x8xf32>
    %103 = arith.select %100, %98, %102 : vector<8x8xi1>, vector<8x8xf32>
    %104 = arith.addf %103, %6 : vector<8x8xf32>
    %cst_43 = arith.constant dense<0xFF800000> : vector<8xf32>
    %105 = vector.multi_reduction <maximumf>, %104, %cst_43 [1] : vector<8x8xf32> to vector<8xf32>
    %106 = vector.shape_cast %105 : vector<8xf32> to vector<8x1xf32>
    %107 = vector.broadcast %106 : vector<8x1xf32> to vector<8x8xf32>
    %108 = arith.subf %104, %107 : vector<8x8xf32>
    %109 = math.exp %108 : vector<8x8xf32>
    %cst_44 = arith.constant dense<0.000000e+00> : vector<8xf32>
    %110 = vector.multi_reduction <add>, %109, %cst_44 [1] : vector<8x8xf32> to vector<8xf32>
    %111 = vector.shape_cast %110 : vector<8xf32> to vector<8x1xf32>
    %112 = vector.extract_strided_slice %41 {offsets = [0, 16], sizes = [8, 8], strides = [1, 1]} : vector<8x32xf32> to vector<8x8xf32>
    %cst_45 = arith.constant dense<0.000000e+00> : vector<8x8xf32>
    %113 = tpu.matmul %109, %112, %cst_45 {dimension_numbers = #tpu.dot_dimension_numbers<[1], [0], [0], [1], [0, 0, 1, 1], [], []>} : vector<8x8xf32>, vector<8x8xf32>, vector<8x8xf32> -> vector<8x8xf32>
    %114 = tpu.reciprocal %111 {approx = true} : vector<8x1xf32> -> vector<8x1xf32>
    %115 = vector.broadcast %114 : vector<8x1xf32> to vector<8x8xf32>
    %116 = arith.mulf %113, %115 : vector<8x8xf32>
    %117 = vector.extract_strided_slice %45 {offsets = [0, 3], sizes = [8, 1], strides = [1, 1]} : vector<8x4xf32> to vector<8x1xf32>
    %118 = vector.extract_strided_slice %47 {offsets = [3, 0], sizes = [1, 8], strides = [1, 1]} : vector<4x8xf32> to vector<1x8xf32>
    %119 = vector.broadcast %117 : vector<8x1xf32> to vector<8x8xf32>
    %120 = vector.broadcast %118 : vector<1x8xf32> to vector<8x8xf32>
    %121 = arith.addf %119, %120 : vector<8x8xf32>
    %cst_46 = arith.constant 0.000000e+00 : f32
    %122 = vector.broadcast %cst_46 : f32 to vector<8x8xf32>
    %123 = arith.cmpf ogt, %121, %122 : vector<8x8xf32>
    %cst_47 = arith.constant 1.000000e-01 : f32
    %124 = vector.broadcast %cst_47 : f32 to vector<8x8xf32>
    %125 = arith.mulf %124, %121 : vector<8x8xf32>
    %126 = arith.select %123, %121, %125 : vector<8x8xi1>, vector<8x8xf32>
    %127 = arith.addf %126, %6 : vector<8x8xf32>
    %cst_48 = arith.constant dense<0xFF800000> : vector<8xf32>
    %128 = vector.multi_reduction <maximumf>, %127, %cst_48 [1] : vector<8x8xf32> to vector<8xf32>
    %129 = vector.shape_cast %128 : vector<8xf32> to vector<8x1xf32>
    %130 = vector.broadcast %129 : vector<8x1xf32> to vector<8x8xf32>
    %131 = arith.subf %127, %130 : vector<8x8xf32>
    %132 = math.exp %131 : vector<8x8xf32>
    %cst_49 = arith.constant dense<0.000000e+00> : vector<8xf32>
    %133 = vector.multi_reduction <add>, %132, %cst_49 [1] : vector<8x8xf32> to vector<8xf32>
    %134 = vector.shape_cast %133 : vector<8xf32> to vector<8x1xf32>
    %135 = vector.extract_strided_slice %41 {offsets = [0, 24], sizes = [8, 8], strides = [1, 1]} : vector<8x32xf32> to vector<8x8xf32>
    %cst_50 = arith.constant dense<0.000000e+00> : vector<8x8xf32>
    %136 = tpu.matmul %132, %135, %cst_50 {dimension_numbers = #tpu.dot_dimension_numbers<[1], [0], [0], [1], [0, 0, 1, 1], [], []>} : vector<8x8xf32>, vector<8x8xf32>, vector<8x8xf32> -> vector<8x8xf32>
    %137 = tpu.reciprocal %134 {approx = true} : vector<8x1xf32> -> vector<8x1xf32>
    %138 = vector.broadcast %137 : vector<8x1xf32> to vector<8x8xf32>
    %139 = arith.mulf %136, %138 : vector<8x8xf32>
    %140 = tpu.concatenate %70, %93, %116, %139 in 1 : vector<8x8xf32>, vector<8x8xf32>, vector<8x8xf32>, vector<8x8xf32> -> vector<8x32xf32>
    %141 = arith.addf %4, %140 : vector<8x32xf32>
    %cst_51 = arith.constant dense<0.000000e+00> : vector<8xf32>
    %142 = vector.multi_reduction <add>, %141, %cst_51 [1] : vector<8x32xf32> to vector<8xf32>
    %143 = vector.shape_cast %142 : vector<8xf32> to vector<8x1xf32>
    %cst_52 = arith.constant 3.200000e+01 : f32
    %144 = vector.broadcast %cst_52 : f32 to vector<8x1xf32>
    %145 = arith.divf %143, %144 : vector<8x1xf32>
    %146 = vector.broadcast %145 : vector<8x1xf32> to vector<8x32xf32>
    %147 = arith.subf %141, %146 : vector<8x32xf32>
    %148 = arith.mulf %147, %147 : vector<8x32xf32>
    %cst_53 = arith.constant dense<0.000000e+00> : vector<8xf32>
    %149 = vector.multi_reduction <add>, %148, %cst_53 [1] : vector<8x32xf32> to vector<8xf32>
    %150 = vector.shape_cast %149 : vector<8xf32> to vector<8x1xf32>
    %cst_54 = arith.constant 3.200000e+01 : f32
    %151 = vector.broadcast %cst_54 : f32 to vector<8x1xf32>
    %152 = arith.divf %150, %151 : vector<8x1xf32>
    %cst_55 = arith.constant 9.99999974E-6 : f32
    %153 = vector.broadcast %cst_55 : f32 to vector<8x1xf32>
    %154 = arith.addf %152, %153 : vector<8x1xf32>
    %155 = math.rsqrt %154 : vector<8x1xf32>
    %156 = vector.broadcast %155 : vector<8x1xf32> to vector<8x32xf32>
    %157 = arith.mulf %147, %156 : vector<8x32xf32>
    %158 = vector.broadcast %12 : vector<1x32xf32> to vector<8x32xf32>
    %159 = arith.mulf %157, %158 : vector<8x32xf32>
    %160 = vector.broadcast %14 : vector<1x32xf32> to vector<8x32xf32>
    %161 = arith.addf %159, %160 : vector<8x32xf32>
    %c0_56 = arith.constant 0 : index
    %c0_57 = arith.constant 0 : index
    %c0_58 = arith.constant 0 : index
    %162 = vector.load %arg6[%c0_56, %c0_57, %c0_58] : memref<1x32x64xf32, #tpu.memory_space<vmem>>, vector<1x32x64xf32>
    %163 = vector.shape_cast %162 : vector<1x32x64xf32> to vector<32x64xf32>
    %cst_59 = arith.constant dense<0.000000e+00> : vector<8x64xf32>
    %164 = tpu.matmul %161, %163, %cst_59 {dimension_numbers = #tpu.dot_dimension_numbers<[1], [0], [0], [1], [0, 0, 1, 1], [], []>} : vector<8x32xf32>, vector<32x64xf32>, vector<8x64xf32> -> vector<8x64xf32>
    %165 = vector.broadcast %16 : vector<1x64xf32> to vector<8x64xf32>
    %166 = arith.addf %164, %165 : vector<8x64xf32>
    %cst_60 = arith.constant 0.000000e+00 : f32
    %167 = vector.broadcast %cst_60 : f32 to vector<8x64xf32>
    %168 = arith.maximumf %166, %167 : vector<8x64xf32>
    %c0_61 = arith.constant 0 : index
    %c0_62 = arith.constant 0 : index
    %c0_63 = arith.constant 0 : index
    %169 = vector.load %arg7[%c0_61, %c0_62, %c0_63] : memref<1x64x32xf32, #tpu.memory_space<vmem>>, vector<1x64x32xf32>
    %170 = vector.shape_cast %169 : vector<1x64x32xf32> to vector<64x32xf32>
    %cst_64 = arith.constant dense<0.000000e+00> : vector<8x32xf32>
    %171 = tpu.matmul %168, %170, %cst_64 {dimension_numbers = #tpu.dot_dimension_numbers<[1], [0], [0], [1], [0, 0, 1, 1], [], []>} : vector<8x64xf32>, vector<64x32xf32>, vector<8x32xf32> -> vector<8x32xf32>
    %172 = arith.addf %141, %171 : vector<8x32xf32>
    %173 = vector.broadcast %18 : vector<1x32xf32> to vector<8x32xf32>
    %174 = arith.addf %172, %173 : vector<8x32xf32>
    %c1_i32 = arith.constant 1 : i32
    %175 = arith.cmpi ne, %arg1, %c1_i32 : i32
    %176 = arith.extui %175 : i1 to i32
    %c0_i32_65 = arith.constant 0 : i32
    %177 = arith.cmpi ne, %176, %c0_i32_65 : i32
    scf.if %177 {
      %c0_68 = arith.constant 0 : index
      %c0_69 = arith.constant 0 : index
      %c0_70 = arith.constant 0 : index
      %181 = vector.load %arg10[%c0_68, %c0_69, %c0_70] : memref<1x8x32xf32, #tpu.memory_space<vmem>>, vector<1x8x32xf32>
      %182 = vector.shape_cast %181 : vector<1x8x32xf32> to vector<8x32xf32>
      %183 = vector.shape_cast %174 : vector<8x32xf32> to vector<1x8x32xf32>
      tpu.vector_store %arg10[%c0_68, %c0_69, %c0_70], %183 {strides = array<i32>} : memref<1x8x32xf32, #tpu.memory_space<vmem>>, vector<1x8x32xf32>,
    } else {
    }
    %c1_i32_66 = arith.constant 1 : i32
    %178 = arith.cmpi eq, %arg1, %c1_i32_66 : i32
    %179 = arith.extui %178 : i1 to i32
    %c0_i32_67 = arith.constant 0 : i32
    %180 = arith.cmpi ne, %179, %c0_i32_67 : i32
    scf.if %180 {
      %c0_68 = arith.constant 0 : index
      %c0_69 = arith.constant 0 : index
      %181 = vector.load %arg9[%c0_68, %c0_69] : memref<2x32xf32, #tpu.memory_space<vmem>>, vector<1x32xf32>
      %c1_70 = arith.constant 1 : index
      %c0_71 = arith.constant 0 : index
      %182 = vector.load %arg9[%c1_70, %c0_71] : memref<2x32xf32, #tpu.memory_space<vmem>>, vector<1x32xf32>
      %cst_72 = arith.constant dense<0.000000e+00> : vector<8xf32>
      %183 = vector.multi_reduction <add>, %174, %cst_72 [1] : vector<8x32xf32> to vector<8xf32>
      %184 = vector.shape_cast %183 : vector<8xf32> to vector<8x1xf32>
      %cst_73 = arith.constant 3.200000e+01 : f32
      %185 = vector.broadcast %cst_73 : f32 to vector<8x1xf32>
      %186 = arith.divf %184, %185 : vector<8x1xf32>
      %187 = vector.broadcast %186 : vector<8x1xf32> to vector<8x32xf32>
      %188 = arith.subf %174, %187 : vector<8x32xf32>
      %189 = arith.mulf %188, %188 : vector<8x32xf32>
      %cst_74 = arith.constant dense<0.000000e+00> : vector<8xf32>
      %190 = vector.multi_reduction <add>, %189, %cst_74 [1] : vector<8x32xf32> to vector<8xf32>
      %191 = vector.shape_cast %190 : vector<8xf32> to vector<8x1xf32>
      %cst_75 = arith.constant 3.200000e+01 : f32
      %192 = vector.broadcast %cst_75 : f32 to vector<8x1xf32>
      %193 = arith.divf %191, %192 : vector<8x1xf32>
      %cst_76 = arith.constant 9.99999974E-6 : f32
      %194 = vector.broadcast %cst_76 : f32 to vector<8x1xf32>
      %195 = arith.addf %193, %194 : vector<8x1xf32>
      %196 = math.rsqrt %195 : vector<8x1xf32>
      %197 = vector.broadcast %196 : vector<8x1xf32> to vector<8x32xf32>
      %198 = arith.mulf %188, %197 : vector<8x32xf32>
      %199 = vector.broadcast %181 : vector<1x32xf32> to vector<8x32xf32>
      %200 = arith.mulf %198, %199 : vector<8x32xf32>
      %201 = vector.broadcast %182 : vector<1x32xf32> to vector<8x32xf32>
      %202 = arith.addf %200, %201 : vector<8x32xf32>
      %c0_77 = arith.constant 0 : index
      %c0_78 = arith.constant 0 : index
      %c0_79 = arith.constant 0 : index
      %203 = vector.load %arg10[%c0_77, %c0_78, %c0_79] : memref<1x8x32xf32, #tpu.memory_space<vmem>>, vector<1x8x32xf32>
      %204 = vector.shape_cast %203 : vector<1x8x32xf32> to vector<8x32xf32>
      %205 = vector.shape_cast %202 : vector<8x32xf32> to vector<1x8x32xf32>
      tpu.vector_store %arg10[%c0_77, %c0_78, %c0_79], %205 {strides = array<i32>} : memref<1x8x32xf32, #tpu.memory_space<vmem>>, vector<1x8x32xf32>,
    } else {
    }
    return
  }
  func.func @transform_0(%arg0: i32, %arg1: i32) -> (i32, i32, i32) {
    %c0_i32 = arith.constant 0 : i32
    %c0_i32_0 = arith.constant 0 : i32
    %c0_i32_1 = arith.constant 0 : i32
    return %arg0, %c0_i32, %c0_i32_0 : i32, i32, i32
  }
  func.func @transform_1(%arg0: i32, %arg1: i32) -> (i32, i32, i32) {
    %c0_i32 = arith.constant 0 : i32
    %c0_i32_0 = arith.constant 0 : i32
    %c0_i32_1 = arith.constant 0 : i32
    return %arg0, %c0_i32, %c0_i32_0 : i32, i32, i32
  }
  func.func @transform_2(%arg0: i32, %arg1: i32) -> (i32, i32, i32) {
    %c0_i32 = arith.constant 0 : i32
    %c0_i32_0 = arith.constant 0 : i32
    %c0_i32_1 = arith.constant 0 : i32
    return %arg1, %c0_i32, %c0_i32_0 : i32, i32, i32
  }
  func.func @transform_3(%arg0: i32, %arg1: i32) -> (i32, i32, i32) {
    %c0_i32 = arith.constant 0 : i32
    %c0_i32_0 = arith.constant 0 : i32
    %c0_i32_1 = arith.constant 0 : i32
    return %arg1, %c0_i32, %c0_i32_0 : i32, i32, i32
  }
  func.func @transform_4(%arg0: i32, %arg1: i32) -> (i32, i32, i32) {
    %c0_i32 = arith.constant 0 : i32
    %c0_i32_0 = arith.constant 0 : i32
    %c0_i32_1 = arith.constant 0 : i32
    return %arg1, %c0_i32, %c0_i32_0 : i32, i32, i32
  }
  func.func @transform_5(%arg0: i32, %arg1: i32) -> (i32, i32, i32) {
    %c0_i32 = arith.constant 0 : i32
    %c0_i32_0 = arith.constant 0 : i32
    %c0_i32_1 = arith.constant 0 : i32
    return %arg1, %c0_i32, %c0_i32_0 : i32, i32, i32
  }
  func.func @transform_6(%arg0: i32, %arg1: i32) -> (i32, i32, i32) {
    %c0_i32 = arith.constant 0 : i32
    %c0_i32_0 = arith.constant 0 : i32
    %c0_i32_1 = arith.constant 0 : i32
    return %arg1, %c0_i32, %c0_i32_0 : i32, i32, i32
  }
  func.func @transform_7(%arg0: i32, %arg1: i32) -> (i32, i32) {
    %c0_i32 = arith.constant 0 : i32
    %c0_i32_0 = arith.constant 0 : i32
    %c0_i32_1 = arith.constant 0 : i32
    return %c0_i32, %c0_i32_0 : i32, i32
  }
  func.func @transform_8(%arg0: i32, %arg1: i32) -> (i32, i32, i32) {
    %c0_i32 = arith.constant 0 : i32
    %c0_i32_0 = arith.constant 0 : i32
    %c0_i32_1 = arith.constant 0 : i32
    return %arg0, %c0_i32, %c0_i32_0 : i32, i32, i32
  }
}

</mosaic_0001>

<bundles_post_ra>
// kernel: tpu_custom_call.1
= control target key start
LH: loop header
LB: loop body
LE: loop exit
PB: predicated region body
PF: predicated region fallthrough
CT: control target
= control target key end

     0   :  { %s2145_s0 = inlined_call_operand.vmem [shape: f32[2,8,32], index: 0, kind: input, shape index: {}]   ;;  %s2146_s1 = inlined_call_operand.vmem [shape: f32[2,8,8], index: 1, kind: input, shape index: {}]   ;;  %s2147_s2 = inlined_call_operand.vmem [shape: f32[2,32,32], index: 2, kind: input, shape index: {}]   ;;  %s2148_s3 = inlined_call_operand.vmem [shape: f32[2,32,8], index: 3, kind: input, shape index: {}]   ;;  %s2149_s4 = inlined_call_operand.vmem [shape: f32[2,32,64], index: 4, kind: input, shape index: {}]   ;;  %s2150_s5 = inlined_call_operand.vmem [shape: f32[2,64,32], index: 5, kind: input, shape index: {}]   ;;  %s2151_s6 = inlined_call_operand.vmem [shape: f32[2,6,64], index: 6, kind: input, shape index: {}]   ;;  %s2152_s7 = inlined_call_operand.vmem [shape: f32[2,32], index: 7, kind: input, shape index: {}]   ;;  %s2153_s8 = inlined_call_operand.hbm [shape: f32[2,8,32], index: 8, kind: output, shape index: {}]  }
   0x1   :  { %2163 = sst [smem:[#allocation14_spill]] %s2145_s0 }
   0x2   :  { %2164 = sst [smem:[#allocation15_spill]] %s2146_s1 }
   0x3   :  { %2165 = sst [smem:[#allocation16_spill]] %s2147_s2 }
   0x4   :  { %13 = vsyncpa [#allocation3], 0 }
   0x5   :  { %15 = vsyncpa [#allocation3 + $0x1], 0  ;;  %s1867_s27 = smov 0   ;;  %s1869_s28 = smov 0  }
   0x6   :  { %s1871_s29 = smov 0   ;;  %s1873_s30 = smov 0  }
   0x7   :  { %s1875_s9 = smov 0   ;;  %s1877_s10 = smov 0  }
   0x8   :  { %s1879_s11 = smov 0   ;;  %s1881_s12 = smov 0  }
   0x9 LB: > { %2166 = sst [smem:[#allocation5_spill]] %s1778_s27  ;;  %s1455_s13 = sadd.s32 4294967295, %s1806_s12   ;;  %s1806_s12 = sphi %s1881_s12, %s21_s12   ;;  %s1802_s11 = sphi %s1879_s11, %s2189_s11   ;;  %s1798_s10 = sphi %s1877_s10, %s2188_s10   ;;  %s1794_s9 = sphi %s1875_s9, %s2187_s9   ;;  %s1790_s30 = sphi %s1873_s30, %s2186_s30   ;;  %s1786_s29 = sphi %s1871_s29, %s2185_s29   ;;  %s1782_s28 = sphi %s1869_s28, %s2191_s28   ;;  %s1778_s27 = sphi %s1867_s27, %s2190_s27  }
   0xa   : > { %2167 = sst [smem:[#allocation6_spill]] %s1786_s29  ;;  %s1456_s14 = sadd.s32 4294967294, %s1806_s12  }
   0xb   : > { %2168 = sst [smem:[#allocation7_spill]] %s1798_s10  ;;  %s30_s15 = sadd.s32 1, %s1798_s10 }
   0xc   : > { %2169 = sst [smem:[#allocation8_spill]] %s1802_s11  ;;  %p31_p0 = scmp.ge.s32.totalorder %s30_s15, 2 }
   0xd   : > { %2170 = sst [smem:[#allocation9_spill]] %s1806_s12  ;;  %s33_s16 = sadd.s32 1, %s1802_s11 }
   0xe   : > { %p253_p1 = scmp.ne.s32.totalorder %s1786_s29, %s1782_s28  ;;  %p254_p2 = scmp.eq.s32.totalorder %s1455_s13, 3 }
   0xf   : > { %s2193_s15 = smov (%p31_p0, %s30_s15), 0  ;;  %s2195_s16 = smov (!%p31_p0, %s33_s16), %s1802_s11 }
  0x10   : > { %2171 = sst [smem:[#allocation10_spill]] %s2193_s15  ;;  %p1916_p3 = por %p254_p2, %p253_p1 }
  0x11   : > { %p259_p4 = scmp.ne.s32.totalorder %s1782_s28, %s1778_s27  ;;  %p35_p5 = scmp.ge.s32.totalorder %s2195_s16, 2 }
  0x12   : > { %p260_p6 = scmp.eq.s32.totalorder %s1456_s14, 3  ;;  %p1459_p7 = scmp.ge.s32.totalorder %s1806_s12, 1 }
  0x13   : > { %p334_p8 = scmp.lt.s32.totalorder %s1806_s12, 5  ;;  %s2197_s16 = smov (%p35_p5, %s2195_s16), 0 }
  0x14   : > { %2173 = sst [smem:[#allocation11_spill]] %s2197_s16  ;;  %p1926_p9 = por %p260_p6, %p259_p4 }
  0x15   : > { %p335_p10 = pnand %p1459_p7, %p334_p8  ;;  %s240_s19 = ssub.s32 %s1802_s11, %s2197_s16 }
  0x16   : > { %s2174_s18 = scalar_select %p1926_p9, 1, 0 }
  0x17   : > { %s243_s20 = sadd.s32 1, %s1786_s29  ;;  %p241_p11 = scmp.eq.s32.totalorder %s240_s19, 0 }
  0x18   : > { %2175 = sst [smem:[#allocation12_spill]] %s2174_s18  ;;  %338 = sbr.rel (%p335_p10) target bundleno = 2328 (0x918), region = 52 }
  0x19   : > { %s1934_s21 = scalar_select %p241_p11, %s1786_s29, %s243_s20  }
  0x1a   : > { %s2159_s22 = sand.u32 (!%p335_p10), 1, %s1782_s28   ;;  %p395_p12 = scmp.lt.s32.totalorder (!%p335_p10), %s1794_s9, 1 }
  0x1b   : > { %2176 = sst [smem:[#allocation13_spill]] %s1934_s21  ;;  %s1460_s23 = sshll.u32 (!%p335_p10), %s2159_s22, 3 }
  0x1c   : > { %p403_p13 = scmp.lt.s32.totalorder (!%p335_p10), %s1790_s30, 1  ;;  %s2177_s0 = sld [smem:[#allocation14_spill]] (!%p335_p10) }
  0x1d   : > { %s396_s24 = scalar_select %p395_p12, %s1794_s9, 1 }
  0x1e   : > { %s404_s25 = scalar_select %p403_p13, %s1790_s30, 1 }
  0x1f   : > { %s1461_s26 = sshll.u32 %s396_s24, 3  ;;  %s2178_s1 = sld [smem:[#allocation15_spill]] }
  0x20   : > { %s1495_s11 = sshll.u32 %s404_s25, 5  ;;  %s1498_s10 = sshll.u32 %s404_s25, 6 }
  0x21   : > { %s2179_s2 = sld [smem:[#allocation16_spill]]  ;;  %s1959_s24 = scalar_lea.vmem %s2148_s3, %s1495_s11 }
  0x22   : > { %s398_s19 = scalar_lea.vmem %s2177_s0, %s1461_s26  ;;  %s1964_s14 = scalar_lea.vmem %s2149_s4, %s1495_s11 }
  0x23   : > { %s1969_s20 = scalar_lea.vmem %s2150_s5, %s1498_s10  ;;  %s1471_s0 = sshll.u32 %s404_s25, 3 }
  0x24   : > { %s1974_s21 = scalar_lea.vmem %s2151_s6, %s1471_s0  ;;  %p1472_p0 = scmp.ne.s32.totalorder %s1790_s30, 0 }
  0x25   : > { %s1949_s15 = scalar_lea.vmem %s2178_s1, %s1461_s26 }
  0x26   : > { %430 = sbr.rel (%p1472_p0) target bundleno = 45 (0x2d), region = 56 }
  0x27   : > { %s1954_s18 = scalar_lea.vmem %s2179_s2, %s1495_s11  ;;  %s1976_s2 = scalar_lea.vmem [#allocation2], %s1460_s23 }
  0x2b   : > { %v431_v0 = vld [vmem:[%s398_s19] sm:$0xff]  ;;  %vm432_vm0 = vcmask 261120  }
  0x2c   : > { %433 = vst.msk [vmem:[%s1976_s2] sm:$0xff] %vm432_vm0, %v431_v0 }
  0x2d PF: > { %vm442_vm1 = vcmask 261120   ;;  %v470_v8 = vld [vmem:[%s1954_s18 + $0x18] sm:$0xff]  ;;  %v1808_v10 = vmov 0.0   ;;  %v469_v11 = vld [vmem:[%s1954_s18 + $0x10] sm:$0xff]  ;;  %v468_v13 = vld [vmem:[%s1954_s18 + $0x8] sm:$0xff]  ;;  %vm1809_vm2 = vmmov 0   ;;  %v658_v36 = vlaneseq }
  0x2e   : > { %v547_v9 = vld [vmem:[%s1959_s24 + $0x18] sm:$0xff]  ;;  %1531 = vmatprep.subr.mxu0 %v1808_v10  ;;  %1542 = vmatprep.subr.mxu1 %v1808_v10  ;;  %v546_v12 = vld [vmem:[%s1959_s24 + $0x10] sm:$0xff]  ;;  %v545_v14 = vld [vmem:[%s1959_s24 + $0x8] sm:$0xff]  ;;  %v1810_v17 = vmov 1   ;;  %v1811_v27 = vmov 0   ;;  %s1812_s0 = smov 124  }
  0x2f   : > { %1532 = vmatpush3.msra.mxu0 %v470_v8  ;;  %1543 = vmatpush3.msra.mxu1 %v547_v9  ;;  %v467_v15 = vld [vmem:[%s1954_s18] sm:$0xff]  ;;  %s1813_s1 = smov 120   ;;  %v1814_v32 = vmov 3   ;;  %v1815_v33 = vmov 2   ;;  %v659_v38 = vshrl.u32 %v658_v36, 7  ;;  %vm667_vm6 = vcmask 64512  }
  0x30   : > { %1533 = vmatprep.subr.mxu0 %v1808_v10  ;;  %1544 = vmatprep.subr.mxu1 %v1808_v10  ;;  %v544_v16 = vld [vmem:[%s1959_s24] sm:$0xff]  ;;  %s1816_s27 = smov 112   ;;  %s1817_s10 = smov 104   ;;  %vm1066_vm8 = vcmask 130048   ;;  %vm1068_vm9 = vcmask 195584   ;;  %vm1184_vm10 = vcmask 523264  }
  0x31   : > { %1534 = vmatpush3.msra.mxu0 %v469_v11  ;;  %1545 = vmatpush3.msra.mxu1 %v546_v12  ;;  %v1473_v22 = vld [vmem:[%s1974_s21] ss:$0 sm:$0xff]  ;;  %v1474_v24 = vld [vmem:[%s1974_s21 + $0x1] ss:$0 sm:$0xff]  ;;  %v660_v40 = vsub.s32 0, %v659_v38  ;;  %v758_v41 = vsub.s32 1, %v659_v38 }
  0x32   : > { %1535 = vmatprep.subr.mxu0 %v1808_v10  ;;  %1546 = vmatprep.subr.mxu1 %v1808_v10  ;;  %v859_v42 = vsub.s32 2, %v659_v38  ;;  %v959_v43 = vsub.s32 3, %v659_v38  ;;  %v435_v54 = vld [vmem:[%s1949_s15] sm:$0xff]  ;;  %s1818_s11 = smov 8   ;;  %s1819_s12 = smov 16  }
  0x33   : > { %v1981_v1 = vld [vmem:[%s1976_s2] sm:$0xff]  ;;  %1536 = vmatpush3.msra.mxu0 %v468_v13  ;;  %1547 = vmatpush3.msra.mxu1 %v545_v14  ;;  %s1820_s15 = smov 24   ;;  %p1487_p1 = scmp.eq.s32.totalorder %s1790_s30, 1 }
  0x34   : > { %v443_v2 = vsel %vm442_vm1, %v1981_v1, 0.0  ;;  %1537 = vmatprep.subr.mxu0 %v1808_v10  ;;  %1548 = vmatprep.subr.mxu1 %v1808_v10 }
  0x35   : > { %444 = vadd.xlane.f32.xlu0 %v443_v2  ;;  %1538 = vmatpush3.msra.mxu0 %v467_v15 }
  0x36   : > { %1539 = vmatprep.mubr.msk.f32.mxu0 %vm1809_vm2, %v1808_v10  ;;  %1549 = vmatpush3.msra.mxu1 %v544_v16 }
  0x37   : > { %1550 = vmatprep.mubr.msk.f32.mxu1 %vm1809_vm2, %v1808_v10  ;;  %1553 = vmatprep.subr.mxu0 %v1808_v10 }
  0x38   : > { %1568 = vmatprep.subr.mxu1 %v1808_v10  ;;  %1688 = vset.pattern.permute.xlu0 %v1810_v17 }
  0x39   : > { %1687 = vset.pattern.permute.xlu1 %v1811_v27 }
  0xbe   : > { %v445_v3 = vpop.xlane.xlu0 %444 }
  0xbf   : > { %v447_v4 = vmul.f32 0.03125, %v445_v3 }
  0xc1   : > { %v448_v5 = vsub.f32 %v1981_v1, %v447_v4 }
  0xc3   : > { %v449_v6 = vmul.f32 %v448_v5, %v448_v5 }
  0xc5   : > { %v450_v7 = vsel %vm442_vm1, %v449_v6, 0.0 }
  0xc6   : > { %451 = vadd.xlane.f32.xlu0 %v450_v7 }
 0x14f   : > { %v452_v18 = vpop.xlane.xlu0 %451 }
 0x150   : > { %v453_v19 = vmul.f32 0.03125, %v452_v18 }
 0x152   : > { %v454_v20 = vadd.f32 1e-05, %v453_v19 }
 0x154   : > { %1692 = vrsqrt.f32 %v454_v20 }
 0x161   : > { %v1693_v21 = vpop.eup %1692 }
 0x162   : > { %v456_v23 = vmul.f32 %v1693_v21, %v448_v5 }
 0x164   : > { %v461_v25 = vmul.f32 %v1473_v22, %v456_v23 }
 0x166   : > { %v466_v26 = vadd.f32 %v1474_v24, %v461_v25 }
 0x168   : > { %1540 = vmatmul.mubr.msk.f32.vlgmr.msra.gmra.mxu0 %vm442_vm1, %v466_v26  ;;  %1551 = vmatmul.mubr.msk.f32.vlgmr.msra.gmra.mxu1 %vm442_vm1, %v466_v26 }
 0x169   : > { %1555 = vmatprep.mubr.msk.f32.mxu0 %vm1809_vm2, %v1808_v10  ;;  %1570 = vmatprep.mubr.msk.f32.mxu1 %vm1809_vm2, %v1808_v10 }
 0x228   : > { %v2017_v28 = vpop.f32.mrf.mxu0  ;;  %v614_v29 = vpop.f32.mrf.mxu1 }
 0x229   : > { %753 = vperm.xlu0 %1688, %v614_v29   ;;  %619 = vrot.lane.b32.xlu1 %v614_v29, %s1812_s0 }
 0x22a   : > { %1554 = vmatpush3.msra.mxu0 %v2017_v28  ;;  %v1541_v30 = vpop.f32.mrf.mxu0  ;;  %v1552_v31 = vpop.f32.mrf.mxu1 }
 0x22b   : > { %1558 = vmatprep.subr.mxu0 %v1808_v10 }
 0x22d   : > { %655 = vperm.xlu1 %1687, %v614_v29   ;;  %775 = vrot.lane.b32.xlu0 %v2017_v28, %s1813_s1 }
 0x22e   : > { %1691 = vset.pattern.permute.xlu0 %v1814_v32 }
 0x231   : > { %1689 = vset.pattern.permute.xlu1 %v1815_v33 }
 0x232   : > { %854 = vperm.xlu1 %1689, %v614_v29  }
 0x236   : > { %1690 = vset.pattern.permute.xlu1 %v1814_v32 }
 0x237   : > { %954 = vperm.xlu1 %1690, %v614_v29  }
 0x29b   : > { %v620_v34 = vpop.permute.xlu1 %619 }
 0x29c   : > { %622 = vxpose.xlu1.b32.start.end [1/1] (short) (narrow) %v620_v34, 8 }
 0x2a4   : > { %v754_v49 = vpop.permute.xlu0 %753 }
 0x2a8   : > { %v656_v35 = vpop.permute.xlu1 %655  ;;  %v776_v8 = vpop.permute.xlu0 %775 }
 0x2ad   : > { %v855_v37 = vpop.permute.xlu1 %854 }
 0x2b2   : > { %v955_v39 = vpop.permute.xlu1 %954 }
 0x318   : > { %v638_v44 = vpop.trf.xlu1 }
 0x319   : > { %v661_v45 = vrot.slane %v638_v44, %v660_v40  ;;  %v759_v46 = vrot.slane %v638_v44, %v758_v41  ;;  %v860_v47 = vrot.slane %v638_v44, %v859_v42  ;;  %v960_v48 = vrot.slane %v638_v44, %v959_v43 }
 0x31b   : > { %v662_v50 = vadd.f32 %v661_v45, %v656_v35  ;;  %v760_v51 = vadd.f32 %v759_v46, %v754_v49  ;;  %v861_v52 = vadd.f32 %v860_v47, %v855_v37  ;;  %v961_v53 = vadd.f32 %v960_v48, %v955_v39 }
 0x31d   : > { %vm761_vm3 = vcmp.gt.f32.partialorder %v760_v51, 0.0  ;;  %v762_v55 = vmul.f32 0.1, %v760_v51  ;;  %vm663_vm4 = vcmp.gt.f32.partialorder %v662_v50, 0.0  ;;  %v664_v56 = vmul.f32 0.1, %v662_v50 }
 0x31e   : > { %vm862_vm5 = vcmp.gt.f32.partialorder %v861_v52, 0.0  ;;  %v863_v57 = vmul.f32 0.1, %v861_v52  ;;  %v963_v60 = vmul.f32 0.1, %v961_v53  ;;  %vm962_vm7 = vcmp.gt.f32.partialorder %v961_v53, 0.0 }
 0x31f   : > { %v763_v58 = vsel %vm761_vm3, %v760_v51, %v762_v55  ;;  %v665_v59 = vsel %vm663_vm4, %v662_v50, %v664_v56 }
 0x320   : > { %v764_v61 = vadd.f32 %v763_v58, %v435_v54  ;;  %v666_v62 = vadd.f32 %v665_v59, %v435_v54  ;;  %v864_v63 = vsel %vm862_vm5, %v861_v52, %v863_v57  ;;  %v964_v4 = vsel %vm962_vm7, %v961_v53, %v963_v60 }
 0x321   : > { %v865_v3 = vadd.f32 %v864_v63, %v435_v54  ;;  %v965_v6 = vadd.f32 %v964_v4, %v435_v54  ;;  %v1094_v4 = vld [vmem:[%s1964_s14] sm:$0xff] }
 0x322   : > { %v765_v0 = vsel %vm667_vm6, %v764_v61, -inf  ;;  %v668_v2 = vsel %vm667_vm6, %v666_v62, -inf }
 0x323   : > { %766 = vmax.xlane.f32.xlu1 %v765_v0  ;;  %669 = vmax.xlane.f32.xlu0 %v668_v2  ;;  %v866_v5 = vsel %vm667_vm6, %v865_v3, -inf  ;;  %v966_v7 = vsel %vm667_vm6, %v965_v6, -inf  ;;  %v1097_v2 = vld [vmem:[%s1964_s14 + $0x18] sm:$0xff] }
 0x327   : > { %867 = vmax.xlane.f32.xlu0 %v866_v5  ;;  %v1183_v5 = vld [vmem:[%s1969_s20 + $0x38] sm:$0xff] }
 0x32b   : > { %967 = vmax.xlane.f32.xlu0 %v966_v7  ;;  %v1181_v7 = vld [vmem:[%s1969_s20 + $0x28] sm:$0xff] }
 0x334   : > { %875 = vrot.lane.b32.xlu1 %v2017_v28, %s1816_s27 }
 0x341   : > { %975 = vrot.lane.b32.xlu0 %v2017_v28, %s1817_s10 }
 0x3ac   : > { %v767_v9 = vpop.xlane.xlu1 %766  ;;  %v670_v11 = vpop.xlane.xlu0 %669 }
 0x3ad   : > { %v768_v12 = vsub.f32 %v764_v61, %v767_v9  ;;  %v671_v13 = vsub.f32 %v666_v62, %v670_v11  ;;  %v1179_v9 = vld [vmem:[%s1969_s20 + $0x18] sm:$0xff] }
 0x3af   : > { %v769_v14 = vmul.f32 1.442695, %v768_v12  ;;  %v672_v15 = vmul.f32 1.442695, %v671_v13 }
 0x3b0   : > { %v868_v16 = vpop.xlane.xlu0 %867  ;;  %v876_v29 = vpop.permute.xlu1 %875 }
 0x3b1   : > { %1694 = vpow2.f32 %v769_v14  ;;  %v869_v17 = vsub.f32 %v865_v3, %v868_v16  ;;  %v1095_v3 = vld [vmem:[%s1964_s14 + $0x8] sm:$0xff] }
 0x3b2   : > { %1696 = vpow2.f32 %v672_v15  ;;  %v1481_v15 = vld [vmem:[%s1974_s21 + $0x2] ss:$0 sm:$0xff] }
 0x3b3   : > { %v870_v18 = vmul.f32 1.442695, %v869_v17  ;;  %v1482_v17 = vld [vmem:[%s1974_s21 + $0x3] ss:$0 sm:$0xff] }
 0x3b4   : > { %v968_v19 = vpop.xlane.xlu0 %967 }
 0x3b5   : > { %1698 = vpow2.f32 %v870_v18  ;;  %v969_v20 = vsub.f32 %v965_v6, %v968_v19  ;;  %v1182_v6 = vld [vmem:[%s1969_s20 + $0x30] sm:$0xff] }
 0x3b7   : > { %v970_v21 = vmul.f32 1.442695, %v969_v20  ;;  %v1178_v20 = vld [vmem:[%s1969_s20 + $0x10] sm:$0xff] }
 0x3b8   : > { %v976_v22 = vpop.permute.xlu0 %975 }
 0x3b9   : > { %1700 = vpow2.f32 %v970_v21  ;;  %1569 = vmatpush3.msra.mxu1 %v976_v22  ;;  %v1177_v21 = vld [vmem:[%s1969_s20 + $0x8] sm:$0xff]  ;;  %v1176_v22 = vld [vmem:[%s1969_s20] sm:$0xff] }
 0x3ba   : > { %1584 = vmatprep.subr.mxu1 %v1808_v10 }
 0x3be   : > { %v1695_v23 = vpop.eup %1694 }
 0x3bf   : > { %v1697_v24 = vpop.eup %1696  ;;  %v771_v25 = vsel %vm667_vm6, %v1695_v23, 0.0 }
 0x3c0   : > { %1556 = vmatmul.mubr.msk.f32.vlgmr.msra.gmra.mxu0 %vm667_vm6, %v1697_v24  ;;  %772 = vadd.xlane.f32.xlu1 %v771_v25  ;;  %v674_v27 = vsel %vm667_vm6, %v1697_v24, 0.0 }
 0x3c1   : > { %1559 = vmatpush3.msra.mxu0 %v776_v8  ;;  %1560 = vmatprep.mubr.msk.f32.mxu0 %vm1809_vm2, %v1808_v10  ;;  %v1180_v8 = vld [vmem:[%s1969_s20 + $0x20] sm:$0xff] }
 0x3c2   : > { %v1699_v26 = vpop.eup %1698  ;;  %1563 = vmatprep.subr.mxu0 %v1808_v10 }
 0x3c3   : > { %v872_v28 = vsel %vm667_vm6, %v1699_v26, 0.0 }
 0x3c4   : > { %1561 = vmatmul.mubr.msk.f32.vlgmr.msra.gmra.mxu0 %vm667_vm6, %v1695_v23  ;;  %675 = vadd.xlane.f32.xlu1 %v674_v27  ;;  %v1483_v23 = vld [vmem:[%s1974_s21 + $0x4] ss:$0 sm:$0xff] }
 0x3c5   : > { %1564 = vmatpush3.msra.mxu0 %v876_v29  ;;  %873 = vadd.xlane.f32.xlu0 %v872_v28  ;;  %v1486_v28 = vld [vmem:[%s1974_s21 + $0x5] ss:$0 sm:$0xff] }
 0x3c6   : > { %v1701_v30 = vpop.eup %1700  ;;  %1565 = vmatprep.mubr.msk.f32.mxu0 %vm1809_vm2, %v1808_v10  ;;  %1573 = vmatprep.subr.mxu0 %v1808_v10 }
 0x3c7   : > { %1571 = vmatmul.mubr.msk.f32.vlgmr.msra.gmra.mxu1 %vm667_vm6, %v1701_v30  ;;  %v972_v31 = vsel %vm667_vm6, %v1701_v30, 0.0 }
 0x3c8   : > { %1566 = vmatmul.mubr.msk.f32.vlgmr.msra.gmra.mxu0 %vm667_vm6, %v1699_v26  ;;  %1600 = vmatprep.mubr.msk.f32.mxu1 %vm1809_vm2, %v1808_v10 }
 0x3c9   : > { %973 = vadd.xlane.f32.xlu0 %v972_v31  ;;  %1581 = vmatprep.mubr.msk.f32.mxu0 %vm1809_vm2, %v1808_v10 }
 0x3ca   : > { %1574 = vmatpush3.msra.mxu0 %v1097_v2  ;;  %1585 = vmatpush3.msra.mxu1 %v1183_v5 }
 0x3cb   : > { %1575 = vmatprep.subr.mxu0 %v1808_v10  ;;  %1586 = vmatprep.subr.mxu1 %v1808_v10 }
 0x3cc   : > { %1587 = vmatpush3.msra.mxu1 %v1182_v6 }
 0x3cd   : > { %1588 = vmatprep.subr.mxu1 %v1808_v10 }
 0x3ce   : > { %1589 = vmatpush3.msra.mxu1 %v1181_v7 }
 0x3cf   : > { %1590 = vmatprep.subr.mxu1 %v1808_v10 }
 0x3d0   : > { %1591 = vmatpush3.msra.mxu1 %v1180_v8 }
 0x3d1   : > { %1592 = vmatprep.subr.mxu1 %v1808_v10 }
 0x3d2   : > { %1593 = vmatpush3.msra.mxu1 %v1179_v9 }
 0x3d3   : > { %1594 = vmatprep.subr.mxu1 %v1808_v10 }
 0x3d4   : > { %1595 = vmatpush3.msra.mxu1 %v1178_v20 }
 0x3d5   : > { %1596 = vmatprep.subr.mxu1 %v1808_v10 }
 0x3d6   : > { %1597 = vmatpush3.msra.mxu1 %v1177_v21 }
 0x3d7   : > { %1598 = vmatprep.subr.mxu1 %v1808_v10 }
 0x3d8   : > { %1599 = vmatpush3.msra.mxu1 %v1176_v22 }
 0x449   : > { %v773_v32 = vpop.xlane.xlu1 %772 }
 0x44a   : > { %1702 = vrcp.f32 %v773_v32 }
 0x44d   : > { %v676_v49 = vpop.xlane.xlu1 %675 }
 0x44e   : > { %v874_v33 = vpop.xlane.xlu0 %873 }
 0x44f   : > { %1704 = vrcp.f32 %v874_v33 }
 0x452   : > { %v974_v34 = vpop.xlane.xlu0 %973 }
 0x453   : > { %1706 = vrcp.f32 %v974_v34 }
 0x454   : > { %1708 = vrcp.f32 %v676_v49 }
 0x457   : > { %v1703_v37 = vpop.eup %1702 }
 0x45c   : > { %v1705_v42 = vpop.eup %1704 }
 0x460   : > { %v1707_v47 = vpop.eup %1706 }
 0x461   : > { %v1709_v50 = vpop.eup %1708 }
 0x480   : > { %v746_v35 = vpop.f32.mrf.mxu0 }
 0x481   : > { %v751_v53 = vmul.f32 %v1709_v50, %v746_v35 }
 0x482   : > { %v1557_v36 = vpop.f32.mrf.mxu0 }
 0x484   : > { %v847_v38 = vpop.f32.mrf.mxu0 }
 0x485   : > { %v852_v39 = vmul.f32 %v1703_v37, %v847_v38 }
 0x486   : > { %v1562_v40 = vpop.f32.mrf.mxu0 }
 0x487   : > { %1054 = vrot.lane.b32.xlu0 %v852_v39, %s1818_s11  ;;  %v1047_v41 = vpop.f32.mrf.mxu1 }
 0x488   : > { %v947_v43 = vpop.f32.mrf.mxu0  ;;  %v1052_v48 = vmul.f32 %v1707_v47, %v1047_v41 }
 0x489   : > { %v952_v44 = vmul.f32 %v1705_v42, %v947_v43  ;;  %v1572_v45 = vpop.f32.mrf.mxu1 }
 0x48a   : > { %v1567_v46 = vpop.f32.mrf.mxu0 }
 0x48b   : > { %1058 = vrot.lane.b32.xlu1 %v952_v44, %s1819_s12 }
 0x48f   : > { %1062 = vrot.lane.b32.xlu1 %v1052_v48, %s1820_s15 }
 0x4f9   : > { %v1055_v51 = vpop.permute.xlu0 %1054 }
 0x4fa   : > { %v1065_v54 = vsel %vm667_vm6, %v751_v53, %v1055_v51 }
 0x4fd   : > { %v1059_v52 = vpop.permute.xlu1 %1058 }
 0x4fe   : > { %v1067_v55 = vsel %vm1066_vm8, %v1065_v54, %v1059_v52 }
 0x501   : > { %v1063_v56 = vpop.permute.xlu1 %1062 }
 0x502   : > { %v1069_v57 = vsel %vm1068_vm9, %v1067_v55, %v1063_v56 }
 0x503   : > { %v2050_v58 = vadd.f32 %v1069_v57, %v1981_v1  ;;  %v1096_v1 = vld [vmem:[%s1964_s14 + $0x10] sm:$0xff] }
 0x504   : > { %1576 = vmatpush3.msra.mxu0 %v1096_v1 }
 0x505   : > { %v1071_v59 = vsel %vm442_vm1, %v2050_v58, 0.0  ;;  %1577 = vmatprep.subr.mxu0 %v1808_v10 }
 0x506   : > { %1072 = vadd.xlane.f32.xlu0 %v1071_v59  ;;  %1578 = vmatpush3.msra.mxu0 %v1095_v3 }
 0x507   : > { %1579 = vmatprep.subr.mxu0 %v1808_v10 }
 0x508   : > { %1580 = vmatpush3.msra.mxu0 %v1094_v4 }
 0x58f   : > { %v1073_v60 = vpop.xlane.xlu0 %1072 }
 0x590   : > { %v1074_v61 = vmul.f32 0.03125, %v1073_v60 }
 0x592   : > { %v1075_v62 = vsub.f32 %v2050_v58, %v1074_v61 }
 0x594   : > { %v1076_v63 = vmul.f32 %v1075_v62, %v1075_v62 }
 0x596   : > { %v1077_v0 = vsel %vm442_vm1, %v1076_v63, 0.0 }
 0x597   : > { %1078 = vadd.xlane.f32.xlu1 %v1077_v0 }
 0x620   : > { %v1079_v11 = vpop.xlane.xlu1 %1078 }
 0x621   : > { %v1080_v12 = vmul.f32 0.03125, %v1079_v11 }
 0x623   : > { %v1081_v13 = vadd.f32 1e-05, %v1080_v12 }
 0x625   : > { %1710 = vrsqrt.f32 %v1081_v13 }
 0x632   : > { %v1711_v14 = vpop.eup %1710 }
 0x633   : > { %v1083_v16 = vmul.f32 %v1711_v14, %v1075_v62 }
 0x635   : > { %v1088_v18 = vmul.f32 %v1481_v15, %v1083_v16 }
 0x637   : > { %v1093_v19 = vadd.f32 %v1482_v17, %v1088_v18 }
 0x639   : > { %1582 = vmatmul.mubr.msk.f32.vlgmr.msra.gmra.mxu0 %vm442_vm1, %v1093_v19 }
 0x6f9   : > { %v1171_v24 = vpop.f32.mrf.mxu0 }
 0x6fa   : > { %v1172_v25 = vadd.f32 %v1483_v23, %v1171_v24 }
 0x6fb   : > { %v1583_v26 = vpop.f32.mrf.mxu0 }
 0x6fc   : > { %v1175_v27 = vmax.f32 %v1172_v25, 0.0 }
 0x6fe   : > { %1601 = vmatmul.mubr.msk.f32.vlgmr.msra.gmra.mxu1 %vm1184_vm10, %v1175_v27 }
 0x7bd   : > { %1267 = sbr.rel (%p1487_p1) target bundleno = 1988 (0x7c4), region = 60 }
 0x7be   : > { %v1254_v29 = vpop.f32.mrf.mxu1 }
 0x7bf   : > { %v1258_v30 = vadd.f32 %v1254_v29, %v2050_v58 }
 0x7c0   : > { %v1602_v31 = vpop.f32.mrf.mxu1 }
 0x7c1   : > { %v1263_v32 = vadd.f32 %v1486_v28, %v1258_v30 }
 0x7c3   : > { %1268 = vst.msk [vmem:[%s1976_s2] sm:$0xff] %vm442_vm1, %v1263_v32 }
 0x7c4 PF: > { %p1488_p2 = scmp.ne.s32.totalorder %s1790_s30, 1 }
 0x7c6   : > { %1272 = sbr.rel (%p1488_p2) target bundleno = 2304 (0x900), region = 64 }
 0x7cb   : > { %v1275_v10 = vsel %vm442_vm1, %v1263_v32, 0.0  ;;  %v1489_v42 = vld [vmem:[%s2152_s7] ss:$0 sm:$0xff]  ;;  %v1490_v44 = vld [vmem:[%s2152_s7 + $0x1] ss:$0 sm:$0xff] }
 0x7cc   : > { %1276 = vadd.xlane.f32.xlu0 %v1275_v10 }
 0x855   : > { %v1277_v33 = vpop.xlane.xlu0 %1276 }
 0x856   : > { %v1278_v34 = vmul.f32 0.03125, %v1277_v33 }
 0x858   : > { %v1279_v35 = vsub.f32 %v1263_v32, %v1278_v34 }
 0x85a   : > { %v1280_v36 = vmul.f32 %v1279_v35, %v1279_v35 }
 0x85c   : > { %v1281_v37 = vsel %vm442_vm1, %v1280_v36, 0.0 }
 0x85d   : > { %1282 = vadd.xlane.f32.xlu0 %v1281_v37 }
 0x8e6   : > { %v1283_v38 = vpop.xlane.xlu0 %1282 }
 0x8e7   : > { %v1284_v39 = vmul.f32 0.03125, %v1283_v38 }
 0x8e9   : > { %v1285_v40 = vadd.f32 1e-05, %v1284_v39 }
 0x8eb   : > { %1712 = vrsqrt.f32 %v1285_v40 }
 0x8f8   : > { %v1713_v41 = vpop.eup %1712 }
 0x8f9   : > { %v1287_v43 = vmul.f32 %v1713_v41, %v1279_v35 }
 0x8fb   : > { %v1292_v45 = vmul.f32 %v1489_v42, %v1287_v43 }
 0x8fd   : > { %v1297_v46 = vadd.f32 %v1490_v44, %v1292_v45 }
 0x8ff   : > { %1298 = vst.msk [vmem:[%s1976_s2] sm:$0xff] %vm442_vm1, %v1297_v46 }
 0x900 PF: > { %s1492_s25 = sshll.u32 %s1794_s9, 7  ;;  %s1313_s14 = sshll.u32 %s1976_s2, 4  ;;  %s1314_s14 = int_to_ptr.vmem [resolvable:$true] %s1313_s14 }
 0x901   : > { %s1311_s13 = scalar_lea.hbm %s2153_s8, %s1492_s25  ;;  %s2180_s16 = sand.u32 1, %s1782_s28  }
 0x902   : > { %s1300_s26 = scalar_lea.sflag [#allocation3], %s2180_s16  ;;  %s1714_s20 = scalar_lea.vmem %s1314_s14, 128 }
 0x903   : > { %p1715_p4 = scmp.ne.s32.totalorder %s1314_s14, %s1714_s20  ;;  %s1821_s29 = smov [#allocation2]  }
 0x904   : > { %s1718_s21 = sshll.u32 %s1821_s29, 4  ;;  %s1719_s21 = int_to_ptr.vmem [resolvable:$false] %s1718_s21 }
 0x905   : > { %p1716_p5 = pnand %p1715_p4, %p1916_p3  ;;  %s1720_s0 = scalar_lea.vmem %s1719_s21, 256 }
 0x906   : > { %p1721_p7 = scmp.lt.s32.totalorder %s1314_s14, %s1719_s21  ;;  %p1722_p8 = scmp.lt.s32.totalorder %s1720_s0, %s1714_s20 }
 0x907   : > { %p1717_p6 = pneg %p1716_p5 }
 0x908   : > { %p1723_p10 = por %p1722_p8, %p1721_p7 }
 0x90a   : > { %p1724_p11 = pnand %p1723_p10, %p1717_p6 }
 0x90c   : > { %1727 = shalt.err (!%p1724_p11)
}
 0x90d   : > { %s1728_s9 = scalar_lea.hbm %s1311_s13, 128  ;;  %s1732_s27 = scalar_lea.hbm %s2153_s8, 256 }
 0x90e   : > { %p1729_p12 = scmp.ne.s32.totalorder %s1311_s13, %s1728_s9  ;;  %p1733_p1 = scmp.lt.s32.totalorder %s1311_s13, %s2153_s8 }
 0x90f   : > { %p1734_p2 = scmp.lt.s32.totalorder %s1732_s27, %s1728_s9 }
 0x910   : > { %p1730_p13 = pnand %p1729_p12, %p1916_p3 }
 0x911   : > { %p1735_p4 = por %p1734_p2, %p1733_p1 }
 0x912   : > { %p1731_p0 = pneg %p1730_p13 }
 0x914   : > { %p1736_p5 = pnand %p1735_p4, %p1731_p0 }
 0x916   : > { %1739 = shalt.err (!%p1736_p5)
}
 0x917   : > { %1603 = dma.vmem_to_hbm [thread:$0]  (%p1916_p3), %s1314_s14, 128, %s1311_s13, %s1300_s26  }
 0x918 PF: > { %s2181_s12 = sld [smem:[#allocation9_spill]] }
 0x919   : > { %s2182_s15 = sld [smem:[#allocation5_spill]] }
 0x91e   : > { %p1609_p6 = scmp.ge.s32.totalorder %s2181_s12, 2 }
 0x91f   : > { %s1325_s22 = sand.u32 1, %s2182_s15  }
 0x920   : > { %p1606_p7 = pnand %p1609_p6, %p1926_p9  ;;  %s1326_s30 = scalar_lea.sflag [#allocation3], %s1325_s22 }
 0x922   : > { %p1607_p8 = pneg %p1606_p7 }
 0x924   : > { %1773 = dma.done.wait (%p1607_p8), %s1326_s30, 128  }
 0x925   : > { %1775 = vsyncadd (%p1607_p8), %s1326_s30, 4294967168  ;;  %s21_s12 = sadd.s32 1, %s2181_s12   ;;  %s2184_s23 = sld [smem:[#allocation6_spill]] }
 0x926   : > { %p18_p10 = scmp.ge.s32.totalorder %s21_s12, 6   ;;  %s2185_s29 = sld [smem:[#allocation13_spill]] }
 0x927   : > { %s2186_s30 = sld [smem:[#allocation7_spill]]  ;;  %s2190_s27 = smov %s1782_s28 }
 0x928   : > { %s2187_s9 = sld [smem:[#allocation8_spill]]  ;;  %20 = sbr.rel (!%p18_p10) target bundleno = 9 (0x9), region = 117 }
 0x929   : > { %s2188_s10 = sld [smem:[#allocation10_spill]] }
 0x92a   : > { %s2189_s11 = sld [smem:[#allocation11_spill]] }
 0x92b   : > { %s2191_s28 = smov %s2184_s23 }
 0x92d   :  { %1331 = vsyncpa [#allocation3], 1 }
 0x92e   :  { %1333 = vsyncpa [#allocation3 + $0x1], 1 }

</bundles_post_ra>
